<compile_context>
chip_gen: v7x
topology: tpu7x:2x2x1
jax: 0.10.0
libtpu: 0.0.40
codegen_flags: <defaults>
</compile_context>

<pallas_src>
import functools
import math
from typing import NamedTuple

import jax
import jax.numpy as jnp
from jax.experimental import pallas as pl
from jax.experimental.pallas import tpu as pltpu

_LANE = 128


def _round_up(x, m):
    return ((x + m - 1) // m) * m


def _cdiv(a, b):
    return (a + b - 1) // b


def _physical_vmem_bytes():
    """Per-TensorCore physical VMEM (128 MiB v5e/v6e, 64 MiB v7x)."""
    try:
        return int(pltpu.get_tpu_info().vmem_capacity_bytes)
    except Exception:
        return 64 * 1024 * 1024  # conservative fallback (v7x-sized)


class FFNParams(NamedTuple):
    """Pre-padded / pre-cast FFN parameters (prepare once, reuse per call)."""
    w1: jax.Array        # (dim_p, dh_p)   compute dtype
    b1: jax.Array        # (1, dh_p)       float32
    w2: jax.Array        # (dh_p, dim_p)   compute dtype
    b2: jax.Array        # (1, dim_p)      float32
    dim: int             # un-padded model dim
    dim_hidden: int      # un-padded hidden dim
    tk: int              # hidden-slab width; == dh_p on the weight-resident path


def prepare_ffn_params(w1, b1, w2, b2, *, compute_dtype=jnp.bfloat16, tk=1024):
    """Pad feature dims to lane multiples and cast weights once.

    w1: (dim, dim_hidden), w2: (dim_hidden, dim) -- stored transposed relative
    to PyTorch nn.Linear (in_features, out_features), so the kernel computes a
    plain x @ W. Biases stay float32.
    """
    dim, dim_hidden = w1.shape
    dim_p = _round_up(dim, _LANE)
    dh_128 = _round_up(dim_hidden, _LANE)
    cbytes = jnp.dtype(compute_dtype).itemsize

    physical = _physical_vmem_bytes()
    # Weight-resident fast path: both weight slabs (double-buffered by the
    # pipeline) fit comfortably -> single k step, weights fetched once.
    resident_bytes = 2 * 2 * dim_p * dh_128 * cbytes  # 2 buffers x (W1 + W2)
    if resident_bytes <= int(0.65 * physical):
        nk = 1
        tk_eff = dh_128
    else:
        nk = _cdiv(dh_128, tk)
        tk_eff = _round_up(_cdiv(dh_128, nk), _LANE)
    dh_p = nk * tk_eff

    def pad2(a, rows, cols):
        pr, pc = rows - a.shape[0], cols - a.shape[1]
        return a if (pr == 0 and pc == 0) else jnp.pad(a, ((0, pr), (0, pc)))

    def pad1(a, n):
        p = n - a.shape[0]
        return a if p == 0 else jnp.pad(a, (0, p))

    w1_p = pad2(w1, dim_p, dh_p).astype(compute_dtype)
    w2_p = pad2(w2, dh_p, dim_p).astype(compute_dtype)
    b1_p = pad1(b1.astype(jnp.float32), dh_p).reshape(1, dh_p)
    b2_p = pad1(b2.astype(jnp.float32), dim_p).reshape(1, dim_p)
    return FFNParams(w1_p, b1_p, w2_p, b2_p, dim, dim_hidden, tk_eff)


def ffn_kernel(x_ref, w1_ref, b1_ref, w2_ref, b2_ref, o_ref, *scratch,
               activation, tk, acc_in_out):
    """One (token-tile, out-slab, hidden-slab) step of act(x@W1+b1) @ W2 + b2."""
    acc_ref = o_ref if acc_in_out else scratch[0]
    k = pl.program_id(2)

    @pl.when(k == 0)
    def _():
        # Fold b2 into the accumulator init: added exactly once per output tile.
        acc_ref[...] = jnp.broadcast_to(
            b2_ref[...].astype(acc_ref.dtype), acc_ref.shape)

    # lin1 slab: (tm, dim_p) @ (dim_p, tk) -> (tm, tk), f32 accumulate on MXU.
    h = jnp.dot(x_ref[...], w1_ref[...], preferred_element_type=jnp.float32)

    # b1 is fully resident; slice the current tk chunk (lane-aligned).
    start = pl.multiple_of(k * tk, 128)
    h = h + b1_ref[:, pl.ds(start, tk)].astype(jnp.float32)

    if activation == "relu":
        h = jnp.maximum(h, 0.0)
    else:  # gelu (exact erf form, matching the PyTorch reference)
        h = 0.5 * h * (1.0 + jax.lax.erf(h * 0.7071067811865476))
    # TODO(synk): relu_dropout with p > 0 not implemented (default p=0 -> identity;
    #             would need pltpu.prng_seed + pltpu.prng_random_bits per tile).

    # lin2 partial sum: (tm, tk) @ (tk, dn) accumulated into the resident block.
    acc_ref[...] += jnp.dot(h.astype(w2_ref.dtype), w2_ref[...],
                            preferred_element_type=jnp.float32)

    if not acc_in_out:
        @pl.when(k == pl.num_programs(2) - 1)
        def _():
            o_ref[...] = acc_ref[...].astype(o_ref.dtype)


def transformer_ffn(x, params: FFNParams, *, activation="relu", tm=512,
                    vmem_limit_bytes=None):
    """x: (batch, seq, dim). params: output of prepare_ffn_params()."""
    assert activation in ("relu", "gelu")
    batch, seq, dim = x.shape
    assert dim == params.dim, "x feature dim does not match prepared params"

    out_dtype = x.dtype
    compute_dtype = params.w1.dtype
    dim_p, dh_p = params.w1.shape
    tk_eff = params.tk
    nk = dh_p // tk_eff

    tokens = batch * seq
    itemsize = jnp.dtype(compute_dtype).itemsize
    row_mult = {4: 8, 2: 16, 1: 32}.get(itemsize, 8)

    # ---- token tiling: big tiles, but no pathological padding ---------------
    nt = _cdiv(tokens, tm)
    tm_eff = _round_up(_cdiv(tokens, nt), row_mult)

    # ---- optional megacore split over the output dim for tiny token counts --
    if nt == 1 and dim_p >= 512 and dim_p % 256 == 0:
        dn = dim_p // 2
    else:
        dn = dim_p
    nj = dim_p // dn

    acc_in_out = (out_dtype == jnp.float32)
    obytes = jnp.dtype(out_dtype).itemsize

    # ---- VMEM accounting (2 pipeline buffers per operand) + tm back-off -----
    physical = _physical_vmem_bytes()

    def vmem_need(tm_):
        need = 2 * (tm_ * dim_p * itemsize          # x tile
                    + dim_p * tk_eff * itemsize     # W1 slab
                    + tk_eff * dn * itemsize        # W2 slab
                    + dh_p * 4 + dn * 4             # b1, b2 (f32)
                    + tm_ * dn * obytes)            # output tile
        if not acc_in_out:
            need += tm_ * dn * 4                    # f32 accumulator scratch
        return need

    budget = int(0.85 * physical)
    while tm_eff > row_mult and vmem_need(tm_eff) > budget:
        tm_eff = _round_up(tm_eff // 2, row_mult)
    nt = _cdiv(tokens, tm_eff)
    tokens_p = nt * tm_eff

    if vmem_limit_bytes is None:
        vmem_limit_bytes = min(int(1.4 * vmem_need(tm_eff)) + (8 << 20),
                               int(0.9 * physical))

    # ---- activations: cast + (cheap) pad per call ----------------------------
    x2d = x.reshape(tokens, dim).astype(compute_dtype)
    if tokens_p != tokens or dim_p != dim:
        x2d = jnp.pad(x2d, ((0, tokens_p - tokens), (0, dim_p - dim)))

    grid = (nt, nj, nk)
    kernel = functools.partial(ffn_kernel, activation=activation, tk=tk_eff,
                               acc_in_out=acc_in_out)
    scratch_shapes = [] if acc_in_out else [pltpu.VMEM((tm_eff, dn), jnp.float32)]

    out2d = pl.pallas_call(
        kernel,
        out_shape=jax.ShapeDtypeStruct((tokens_p, dim_p), out_dtype),
        grid_spec=pltpu.PrefetchScalarGridSpec(
            num_scalar_prefetch=0,
            grid=grid,
            in_specs=[
                pl.BlockSpec((tm_eff, dim_p), lambda i, j, k: (i, 0)),  # x tile
                pl.BlockSpec((dim_p, tk_eff), lambda i, j, k: (0, k)),  # W1 slab
                pl.BlockSpec((1, dh_p),       lambda i, j, k: (0, 0)),  # b1 (resident)
                pl.BlockSpec((tk_eff, dn),    lambda i, j, k: (k, j)),  # W2 slab
                pl.BlockSpec((1, dn),         lambda i, j, k: (0, j)),  # b2
            ],
            out_specs=pl.BlockSpec((tm_eff, dn), lambda i, j, k: (i, j)),
            scratch_shapes=scratch_shapes,
        ),
        compiler_params=pltpu.CompilerParams(
            dimension_semantics=("parallel", "parallel", "arbitrary"),
            vmem_limit_bytes=vmem_limit_bytes),
    )(x2d, params.w1, params.b1, params.w2, params.b2)

    if tokens_p != tokens or dim_p != dim:
        out2d = out2d[:tokens, :dim]
    return out2d.reshape(batch, seq, dim)


def init_params(key, dim, dim_hidden):
    """Deterministic init matching nn.Linear + xavier_uniform_ on weights."""
    k1, k2, k3, k4 = jax.random.split(key, 4)

    # xavier_uniform_: U(-a, a), a = sqrt(6 / (fan_in + fan_out))
    a1 = math.sqrt(6.0 / (dim + dim_hidden))
    a2 = math.sqrt(6.0 / (dim_hidden + dim))
    # Stored as (in, out) = PyTorch weight.T
    w1 = jax.random.uniform(k1, (dim, dim_hidden), jnp.float32, -a1, a1)
    w2 = jax.random.uniform(k2, (dim_hidden, dim), jnp.float32, -a2, a2)

    # nn.Linear default bias init: U(-1/sqrt(fan_in), 1/sqrt(fan_in))
    bb1 = 1.0 / math.sqrt(dim)
    bb2 = 1.0 / math.sqrt(dim_hidden)
    b1 = jax.random.uniform(k3, (dim_hidden,), jnp.float32, -bb1, bb1)
    b2 = jax.random.uniform(k4, (dim,), jnp.float32, -bb2, bb2)
    return w1, b1, w2, b2


def reference_ffn(x, w1, b1, w2, b2, activation="relu"):
    h = x @ w1 + b1
    if activation == "relu":
        h = jnp.maximum(h, 0.0)
    else:
        h = 0.5 * h * (1.0 + jax.lax.erf(h / jnp.sqrt(2.0)))
    return h @ w2 + b2


if __name__ == "__main__":
    batch, seq, dim, dim_hidden = 2, 8, 32, 128

    key = jax.random.PRNGKey(0)
    kx, kp = jax.random.split(key)
    x = jax.random.normal(kx, (batch, seq, dim), jnp.float32)
    w1, b1, w2, b2 = init_params(kp, dim, dim_hidden)

    ref = reference_ffn(x.reshape(-1, dim), w1, b1, w2, b2).reshape(batch, seq, dim)

    # 1) Default path: bf16 operands, f32 accumulation (loose tolerance vs f32).
    params_bf16 = prepare_ffn_params(w1, b1, w2, b2)  # compute_dtype=bf16 default
    out_bf16 = jax.block_until_ready(transformer_ffn(x, params_bf16))
    assert out_bf16.shape == (batch, seq, dim)
    assert jnp.allclose(out_bf16, ref, atol=5e-2, rtol=5e-2), "bf16 path mismatch"

    # 2) Full-precision path (explicit flag) -- tight tolerance vs f32 reference.
    params_f32 = prepare_ffn_params(w1, b1, w2, b2, compute_dtype=jnp.float32)
    out_f32 = jax.block_until_ready(transformer_ffn(x, params_f32))
    assert jnp.allclose(out_f32, ref, atol=1e-5, rtol=1e-5), "f32 path mismatch"

    # 3) bf16 activations end-to-end (exercises the acc-scratch output path).
    out_b16 = jax.block_until_ready(
        transformer_ffn(x.astype(jnp.bfloat16), params_bf16))
    assert out_b16.dtype == jnp.bfloat16
    assert jnp.allclose(out_b16.astype(jnp.float32), ref, atol=6e-2, rtol=6e-2), \
        "bf16-activation path mismatch"

    print("KERNEL_OK")
</pallas_src>

<mosaic_0001>
module attributes {stable_mosaic.version = 11 : i64} {
  func.func @ffn_kernel(%arg0: i32, %arg1: i32, %arg2: i32, %arg3: memref<16x128xbf16, #tpu.memory_space<vmem>>, %arg4: memref<128x128xbf16, #tpu.memory_space<vmem>>, %arg5: memref<1x128xf32, #tpu.memory_space<vmem>>, %arg6: memref<128x128xbf16, #tpu.memory_space<vmem>>, %arg7: memref<1x128xf32, #tpu.memory_space<vmem>>, %arg8: memref<16x128xf32, #tpu.memory_space<vmem>>) attributes {dimension_semantics = [#tpu.dimension_semantics<parallel>, #tpu.dimension_semantics<parallel>, #tpu.dimension_semantics<arbitrary>], iteration_bounds = array<i64: 1, 1, 1>, scalar_prefetch = 0 : i64, scratch_operands = 0 : i64, tpu.core_type = #tpu.core_type<tc>, window_params = [{transform_indices = @transform_0, window_bounds = array<i64: 16, 128>}, {transform_indices = @transform_1, window_bounds = array<i64: 128, 128>}, {pipeline_mode = #tpu.pipeline_mode<synchronous>, transform_indices = @transform_2, window_bounds = array<i64: 1, 128>}, {transform_indices = @transform_3, window_bounds = array<i64: 128, 128>}, {transform_indices = @transform_4, window_bounds = array<i64: 1, 128>}, {transform_indices = @transform_5, window_bounds = array<i64: 16, 128>}]} {
    %c0_i32 = arith.constant 0 : i32
    %0 = arith.cmpi eq, %arg2, %c0_i32 : i32
    %1 = arith.extui %0 : i1 to i32
    %c0_i32_0 = arith.constant 0 : i32
    %2 = arith.cmpi ne, %1, %c0_i32_0 : i32
    scf.if %2 {
      %c0_13 = arith.constant 0 : index
      %c0_14 = arith.constant 0 : index
      %20 = vector.load %arg7[%c0_13, %c0_14] : memref<1x128xf32, #tpu.memory_space<vmem>>, vector<1x128xf32>
      %21 = vector.shape_cast %20 : vector<1x128xf32> to vector<1x128xf32>
      %22 = vector.broadcast %21 : vector<1x128xf32> to vector<16x128xf32>
      %c0_15 = arith.constant 0 : index
      %c0_16 = arith.constant 0 : index
      %23 = vector.load %arg8[%c0_15, %c0_16] : memref<16x128xf32, #tpu.memory_space<vmem>>, vector<16x128xf32>
      tpu.vector_store %arg8[%c0_15, %c0_16], %22 {strides = array<i32>} : memref<16x128xf32, #tpu.memory_space<vmem>>, vector<16x128xf32>,
    } else {
    }
    %c0 = arith.constant 0 : index
    %c0_1 = arith.constant 0 : index
    %3 = vector.load %arg3[%c0, %c0_1] : memref<16x128xbf16, #tpu.memory_space<vmem>>, vector<16x128xbf16>
    %c0_2 = arith.constant 0 : index
    %c0_3 = arith.constant 0 : index
    %4 = vector.load %arg4[%c0_2, %c0_3] : memref<128x128xbf16, #tpu.memory_space<vmem>>, vector<128x128xbf16>
    %cst = arith.constant dense<0.000000e+00> : vector<16x128xf32>
    %5 = tpu.matmul %3, %4, %cst {dimension_numbers = #tpu.dot_dimension_numbers<[1], [0], [0], [1], [0, 0, 1, 1], [], []>} : vector<16x128xbf16>, vector<128x128xbf16>, vector<16x128xf32> -> vector<16x128xf32>
    %c128_i32 = arith.constant 128 : i32
    %6 = arith.muli %arg2, %c128_i32 : i32
    %7 = tpu.assume_multiple %6, 128 : i32
    %c0_4 = arith.constant 0 : index
    %8 = arith.index_cast %7 : i32 to index
    %9 = vector.load %arg5[%c0_4, %8] : memref<1x128xf32, #tpu.memory_space<vmem>>, vector<1x128xf32>
    %10 = vector.broadcast %9 : vector<1x128xf32> to vector<16x128xf32>
    %11 = arith.addf %5, %10 : vector<16x128xf32>
    %cst_5 = arith.constant 0.000000e+00 : f32
    %12 = vector.broadcast %cst_5 : f32 to vector<16x128xf32>
    %13 = arith.maximumf %11, %12 : vector<16x128xf32>
    %c0_6 = arith.constant 0 : index
    %c0_7 = arith.constant 0 : index
    %14 = vector.load %arg8[%c0_6, %c0_7] : memref<16x128xf32, #tpu.memory_space<vmem>>, vector<16x128xf32>
    %15 = arith.truncf %13 : vector<16x128xf32> to vector<16x128xbf16>
    %c0_8 = arith.constant 0 : index
    %c0_9 = arith.constant 0 : index
    %16 = vector.load %arg6[%c0_8, %c0_9] : memref<128x128xbf16, #tpu.memory_space<vmem>>, vector<128x128xbf16>
    %cst_10 = arith.constant dense<0.000000e+00> : vector<16x128xf32>
    %17 = tpu.matmul %15, %16, %cst_10 {dimension_numbers = #tpu.dot_dimension_numbers<[1], [0], [0], [1], [0, 0, 1, 1], [], []>} : vector<16x128xbf16>, vector<128x128xbf16>, vector<16x128xf32> -> vector<16x128xf32>
    %18 = arith.addf %14, %17 : vector<16x128xf32>
    %c0_11 = arith.constant 0 : index
    %c0_12 = arith.constant 0 : index
    %19 = vector.load %arg8[%c0_11, %c0_12] : memref<16x128xf32, #tpu.memory_space<vmem>>, vector<16x128xf32>
    tpu.vector_store %arg8[%c0_11, %c0_12], %18 {strides = array<i32>} : memref<16x128xf32, #tpu.memory_space<vmem>>, vector<16x128xf32>,
    return
  }
  func.func @transform_0(%arg0: i32, %arg1: i32, %arg2: i32) -> (i32, i32) {
    %c0_i32 = arith.constant 0 : i32
    %c0_i32_0 = arith.constant 0 : i32
    return %arg0, %c0_i32 : i32, i32
  }
  func.func @transform_1(%arg0: i32, %arg1: i32, %arg2: i32) -> (i32, i32) {
    %c0_i32 = arith.constant 0 : i32
    %c0_i32_0 = arith.constant 0 : i32
    return %c0_i32, %arg2 : i32, i32
  }
  func.func @transform_2(%arg0: i32, %arg1: i32, %arg2: i32) -> (i32, i32) {
    %c0_i32 = arith.constant 0 : i32
    %c0_i32_0 = arith.constant 0 : i32
    %c0_i32_1 = arith.constant 0 : i32
    return %c0_i32, %c0_i32_0 : i32, i32
  }
  func.func @transform_3(%arg0: i32, %arg1: i32, %arg2: i32) -> (i32, i32) {
    %c0_i32 = arith.constant 0 : i32
    return %arg2, %arg1 : i32, i32
  }
  func.func @transform_4(%arg0: i32, %arg1: i32, %arg2: i32) -> (i32, i32) {
    %c0_i32 = arith.constant 0 : i32
    %c0_i32_0 = arith.constant 0 : i32
    return %c0_i32, %arg1 : i32, i32
  }
  func.func @transform_5(%arg0: i32, %arg1: i32, %arg2: i32) -> (i32, i32) {
    %c0_i32 = arith.constant 0 : i32
    return %arg0, %arg1 : i32, i32
  }
}

</mosaic_0001>

<bundles_post_ra>
// kernel: tpu_custom_call.1
= control target key start
LH: loop header
LB: loop body
LE: loop exit
PB: predicated region body
PF: predicated region fallthrough
CT: control target
= control target key end

     0   :  { %10 = vsyncpa [#allocation3], 0  ;;  %s641_s0 = inlined_call_operand.hbm [shape: bf16[16,128], index: 0, kind: input, shape index: {}]   ;;  %s642_s1 = inlined_call_operand.hbm [shape: bf16[128,128], index: 1, kind: input, shape index: {}]   ;;  %s643_s2 = inlined_call_operand.vmem [shape: f32[1,128], index: 2, kind: input, shape index: {}]   ;;  %s644_s3 = inlined_call_operand.hbm [shape: bf16[128,128], index: 3, kind: input, shape index: {}]   ;;  %s645_s4 = inlined_call_operand.vmem [shape: f32[1,128], index: 4, kind: input, shape index: {}]   ;;  %s646_s5 = inlined_call_operand.hbm [shape: f32[16,128], index: 5, kind: output, shape index: {}]  }
   0x1   :  { %11 = vsyncpa [#allocation6], 0 }
   0x2   :  { %12 = vsyncpa [#allocation4], 0  ;;  %s531_s18 = smov [#allocation5]   ;;  %s532_s20 = smov [#allocation2]  }
   0x3   :  { %s30_s19 = sshll.u32 %s531_s18, 4  ;;  %s18_s21 = sshll.u32 %s532_s20, 4  ;;  %s31_s19 = int_to_ptr.vmem [resolvable:$true] %s30_s19  ;;  %s571_s21 = int_to_ptr.vmem [resolvable:$true] %s18_s21 }
   0x4   :  { %s437_s24 = scalar_lea.hbm %s642_s1, 1024 }
   0x5   :  { %p438_p0 = scmp.ne.s32.totalorder %s642_s1, %s437_s24  ;;  %p441_p1 = scmp.lt.u32.totalorder %s437_s24, %s642_s1 }
   0x7   :  { %p443_p2 = pnand %p441_p1, %p438_p0 }
   0x9   :  { %446 = shalt.err (!%p443_p2)
}
   0xa   :  { %s447_s29 = scalar_lea.vmem %s31_s19, 1024  ;;  %p452_p4 = scmp.lt.s32.totalorder %s31_s19, %s31_s19 }
   0xb   :  { %p448_p3 = scmp.ne.s32.totalorder %s31_s19, %s447_s29  ;;  %p453_p5 = scmp.lt.s32.totalorder %s447_s29, %s447_s29 }
   0xd   :  { %p454_p6 = por %p453_p5, %p452_p4 }
   0xf   :  { %p455_p7 = pnand %p454_p6, %p448_p3 }
  0x11   :  { %458 = shalt.err (!%p455_p7)
}
  0x12   :  { %s533_s30 = smov 64   ;;  %s534_s6 = smov 4  }
  0x13   :  { %36 = dma.hbm_to_vmem [thread:$0]  %s642_s1, 1024, %s31_s19, [#allocation6], %s533_s30, %s533_s30, %s534_s6  }
  0x14   :  { %s459_s11 = scalar_lea.hbm %s641_s0, 128 }
  0x15   :  { %p460_p8 = scmp.ne.s32.totalorder %s641_s0, %s459_s11  ;;  %p463_p9 = scmp.lt.u32.totalorder %s459_s11, %s641_s0 }
  0x17   :  { %p465_p10 = pnand %p463_p9, %p460_p8 }
  0x19   :  { %468 = shalt.err (!%p465_p10)
}
  0x1a   :  { %s469_s16 = scalar_lea.vmem %s571_s21, 128  ;;  %p474_p12 = scmp.lt.s32.totalorder %s571_s21, %s571_s21 }
  0x1b   :  { %p470_p11 = scmp.ne.s32.totalorder %s571_s21, %s469_s16  ;;  %p475_p13 = scmp.lt.s32.totalorder %s469_s16, %s469_s16 }
  0x1d   :  { %p476_p0 = por %p475_p13, %p474_p12 }
  0x1f   :  { %p477_p1 = pnand %p476_p0, %p470_p11 }
  0x21   :  { %480 = shalt.err (!%p477_p1)
}
  0x22   :  { %24 = dma.hbm_to_vmem [thread:$0]  %s641_s0, 128, %s571_s21, [#allocation3], %s533_s30, %s533_s30, %s534_s6  }
  0x23   :  { %s535_s18 = smov [#allocation7]   ;;  %s481_s23 = scalar_lea.hbm %s644_s3, 1024 }
  0x24   :  { %s44_s19 = sshll.u32 %s535_s18, 4  ;;  %p482_p2 = scmp.ne.s32.totalorder %s644_s3, %s481_s23  ;;  %s45_s19 = int_to_ptr.vmem [resolvable:$true] %s44_s19 }
  0x25   :  { %p485_p3 = scmp.lt.u32.totalorder %s481_s23, %s644_s3 }
  0x27   :  { %p487_p4 = pnand %p485_p3, %p482_p2 }
  0x29   :  { %490 = shalt.err (!%p487_p4)
}
  0x2a   :  { %s491_s28 = scalar_lea.vmem %s45_s19, 1024  ;;  %p496_p6 = scmp.lt.s32.totalorder %s45_s19, %s45_s19 }
  0x2b   :  { %p492_p5 = scmp.ne.s32.totalorder %s45_s19, %s491_s28  ;;  %p497_p7 = scmp.lt.s32.totalorder %s491_s28, %s491_s28 }
  0x2d   :  { %p498_p8 = por %p497_p7, %p496_p6 }
  0x2f   :  { %p499_p9 = pnand %p498_p8, %p492_p5 }
  0x31   :  { %502 = shalt.err (!%p499_p9)
}
  0x32   :  { %50 = dma.hbm_to_vmem [thread:$0]  %s644_s3, 1024, %s45_s19, [#allocation6], %s533_s30, %s533_s30, %s534_s6  }
  0x33   :  { %525 = dma.done.wait [#allocation3], 128  }
  0x34   :  { %526 = vsyncadd [#allocation3], 4294967168 }
  0x35   :  { %527 = dma.done.wait [#allocation6], 2048  }
  0x36   :  { %528 = vsyncadd [#allocation6], 4294965248  ;;  %v536_v0 = vmov 0.0   ;;  %vm537_vm0 = vmmov 0   ;;  %v420_v1 = vld [vmem:[#allocation5] sm:$0xff]   ;;  %v421_v2 = vld [vmem:[#allocation5 + $0x8] sm:$0xff]  }
  0x37   :  { %370 = vmatprep.subr.bf16.mxu0 %v536_v0  ;;  %386 = vmatprep.mubr.msk.bf16.mxu0 %vm537_vm0, %v536_v0  ;;  %v422_v3 = vld [vmem:[#allocation5 + $0x10] sm:$0xff]   ;;  %v429_v4 = vld [vmem:[#allocation7] sm:$0xff]   ;;  %v423_v5 = vld [vmem:[#allocation5 + $0x18] sm:$0xff]   ;;  %s538_s7 = smov [#allocation8]  }
  0x38   :  { %390 = vmatprep.subr.bf16.mxu1 %v536_v0  ;;  %406 = vmatprep.mubr.msk.bf16.mxu1 %vm537_vm0, %v536_v0  ;;  %v430_v6 = vld [vmem:[#allocation7 + $0x8] sm:$0xff]   ;;  %v424_v7 = vld [vmem:[#allocation5 + $0x20] sm:$0xff]   ;;  %v431_v8 = vld [vmem:[#allocation7 + $0x10] sm:$0xff]   ;;  %s319_s8 = sshll.u32 %s538_s7, 4  ;;  %s320_s8 = int_to_ptr.vmem [resolvable:$true] %s319_s8 }
  0x39   :  { %371 = vmatpush3.bf16.msra.mxu0 %v420_v1  ;;  %391 = vmatpush3.bf16.msra.mxu1 %v429_v4  ;;  %v425_v9 = vld [vmem:[#allocation5 + $0x28] sm:$0xff]   ;;  %v432_v10 = vld [vmem:[#allocation7 + $0x18] sm:$0xff]   ;;  %v426_v11 = vld [vmem:[#allocation5 + $0x30] sm:$0xff]   ;;  %p508_p11 = scmp.lt.s32.totalorder %s320_s8, %s320_s8 }
  0x3a   :  { %372 = vmatprep.subr.bf16.mxu0 %v536_v0  ;;  %392 = vmatprep.subr.bf16.mxu1 %v536_v0  ;;  %v433_v12 = vld [vmem:[#allocation7 + $0x20] sm:$0xff]   ;;  %v427_v13 = vld [vmem:[#allocation5 + $0x38] sm:$0xff]   ;;  %v434_v14 = vld [vmem:[#allocation7 + $0x28] sm:$0xff]  }
  0x3b   :  { %v428_v15 = vld [vmem:[#allocation2] sm:$0xff]   ;;  %v435_v16 = vld [vmem:[#allocation7 + $0x30] sm:$0xff]  }
  0x3c   :  { %v436_v17 = vld [vmem:[#allocation7 + $0x38] sm:$0xff]  }
  0x3d   :  { %373 = vmatpush3.bf16.msra.mxu0 %v421_v2  ;;  %393 = vmatpush3.bf16.msra.mxu1 %v430_v6  ;;  %v334_v18 = vld [vmem:[%s643_s2] ss:$0 sm:$0xff]  ;;  %s503_s2 = scalar_lea.vmem %s320_s8, 256 }
  0x3e   :  { %374 = vmatprep.subr.bf16.mxu0 %v536_v0  ;;  %394 = vmatprep.subr.bf16.mxu1 %v536_v0  ;;  %v333_v28 = vld [vmem:[%s645_s4] ss:$0 sm:$0xff]  ;;  %p504_p10 = scmp.ne.s32.totalorder %s320_s8, %s503_s2  ;;  %p509_p12 = scmp.lt.s32.totalorder %s503_s2, %s503_s2 }
  0x40   :  { %p510_p13 = por %p509_p12, %p508_p11 }
  0x41   :  { %375 = vmatpush3.bf16.msra.mxu0 %v422_v3  ;;  %395 = vmatpush3.bf16.msra.mxu1 %v431_v8 }
  0x42   :  { %376 = vmatprep.subr.bf16.mxu0 %v536_v0  ;;  %396 = vmatprep.subr.bf16.mxu1 %v536_v0  ;;  %p511_p0 = pnand %p510_p13, %p504_p10 }
  0x45   :  { %377 = vmatpush3.bf16.msra.mxu0 %v423_v5  ;;  %397 = vmatpush3.bf16.msra.mxu1 %v432_v10 }
  0x46   :  { %378 = vmatprep.subr.bf16.mxu0 %v536_v0  ;;  %398 = vmatprep.subr.bf16.mxu1 %v536_v0 }
  0x49   :  { %379 = vmatpush3.bf16.msra.mxu0 %v424_v7  ;;  %399 = vmatpush3.bf16.msra.mxu1 %v433_v12 }
  0x4a   :  { %380 = vmatprep.subr.bf16.mxu0 %v536_v0  ;;  %400 = vmatprep.subr.bf16.mxu1 %v536_v0 }
  0x4d   :  { %381 = vmatpush3.bf16.msra.mxu0 %v425_v9  ;;  %401 = vmatpush3.bf16.msra.mxu1 %v434_v14 }
  0x4e   :  { %382 = vmatprep.subr.bf16.mxu0 %v536_v0  ;;  %402 = vmatprep.subr.bf16.mxu1 %v536_v0 }
  0x51   :  { %383 = vmatpush3.bf16.msra.mxu0 %v426_v11  ;;  %403 = vmatpush3.bf16.msra.mxu1 %v435_v16 }
  0x52   :  { %384 = vmatprep.subr.bf16.mxu0 %v536_v0  ;;  %404 = vmatprep.subr.bf16.mxu1 %v536_v0 }
  0x55   :  { %385 = vmatpush3.bf16.msra.mxu0 %v427_v13  ;;  %405 = vmatpush3.bf16.msra.mxu1 %v436_v17 }
  0x58   :  { %387 = vmatmul.mubr.bf16.vlgmr.msra.gmra.mrb[0].mxu0 %v428_v15 }
 0x12b   :  { %v193_v19 = vpop.f32.mrb[0].mxu0 }
 0x12c   :  { %v194_v20 = vadd.f32 %v334_v18, %v193_v19  ;;  %v388_v21 = vpop.f32.mrb[1].mxu0 }
 0x12d   :  { %v196_v22 = vpop.f32.mrb[2].mxu0 }
 0x12e   :  { %v197_v23 = vadd.f32 %v334_v18, %v196_v22  ;;  %v389_v24 = vpop.f32.mrb[3].mxu0  ;;  %v200_v25 = vmax.f32 %v194_v20, 0.0 }
 0x130   :  { %v201_v26 = vmax.f32 %v197_v23, 0.0 }
 0x132   :  { %v204_v27 = vpack.c.bf16 %v201_v26, %v200_v25 }
 0x134   :  { %407 = vmatmul.mubr.bf16.vlgmr.msra.gmra.mrb[0].mxu1 %v204_v27 }
 0x207   :  { %v303_v29 = vpop.f32.mrb[0].mxu1 }
 0x208   :  { %v310_v30 = vadd.f32 %v333_v28, %v303_v29  ;;  %v408_v31 = vpop.f32.mrb[1].mxu1 }
 0x209   :  { %v306_v32 = vpop.f32.mrb[2].mxu1 }
 0x20a   :  { %312 = vst [vmem:[#allocation8] sm:$0xff] %v310_v30  ;;  %v311_v33 = vadd.f32 %v333_v28, %v306_v32  ;;  %v409_v34 = vpop.f32.mrb[3].mxu1 }
 0x20c   :  { %313 = vst [vmem:[#allocation8 + $0x8] sm:$0xff] %v311_v33 }
 0x20d   :  { %514 = shalt.err (!%p511_p0)
}
 0x20e   :  { %s515_s10 = scalar_lea.hbm %s646_s5, 256 }
 0x20f   :  { %p516_p1 = scmp.ne.s32.totalorder %s646_s5, %s515_s10  ;;  %p519_p2 = scmp.lt.u32.totalorder %s515_s10, %s646_s5 }
 0x211   :  { %p521_p3 = pnand %p519_p2, %p516_p1 }
 0x213   :  { %524 = shalt.err (!%p521_p3)
}
 0x214   :  { %s539_s15 = smov 128   ;;  %s540_s16 = smov 8  }
 0x215   :  { %325 = dma.vmem_to_hbm [thread:$0]  %s320_s8, 256, %s646_s5, [#allocation4], %s539_s15, %s539_s15, %s540_s16  }
 0x216   :  { %529 = dma.done.wait [#allocation4], 256  }
 0x217   :  { %530 = vsyncadd [#allocation4], 4294967040 }
 0x218   :  { %329 = vsyncpa [#allocation3], 1 }
 0x219   :  { %330 = vsyncpa [#allocation6], 1 }
 0x21a   :  { %331 = vsyncpa [#allocation4], 1 }

</bundles_post_ra>
